<compile_context>
chip_gen: v6e
topology: v6e:2x2x1
jax: 0.10.0
libtpu: 0.0.40
codegen_flags: <defaults>
</compile_context>

<pallas_src>
import functools

import jax
import jax.numpy as jnp
from jax.experimental import pallas as pl
from jax.experimental.pallas import tpu as pltpu

_LANES = 128
_SUBLANES = 8
_NCORES = 2           # leading "parallel" grid axis; harmless on 1-TC chips
_TILE_ROWS = 4096     # (4096, 128) f32 block = 2 MiB per input
_SMOOTH = 1e-6        # matches the PyTorch module's smooth=1e-06


def _sigmoid(x):
    # Single EUP op (tanh) instead of exp + reciprocal.
    return 0.5 * jnp.tanh(0.5 * x) + 0.5


def _dice_small_kernel(pred_ref, tgt_ref, inter_ref, denom_ref):
    """Single-block path: the whole (rows, 128) slab is resident in VMEM."""
    p = _sigmoid(pred_ref[...].astype(jnp.float32))
    t = tgt_ref[...].astype(jnp.float32)
    inter_ref[...] = jnp.sum(p * t, axis=0, keepdims=True)
    denom_ref[...] = jnp.sum(p + t, axis=0, keepdims=True)


def _dice_grid_kernel(pred_ref, tgt_ref, inter_ref, denom_ref, *,
                      rows, tile_rows, steps_per_core, ragged):
    """Gridded path.

    Grid is (NCORES, steps_per_core); the leading axis is "parallel" (dual-TC
    on v7x), the trailing axis is the "arbitrary" reduction axis.  Each step
    folds its block to a (1, 128) partial and accumulates into the resident
    lane-dense per-core output block (no full-tile scratch accumulators).
    """
    c = pl.program_id(0)
    i = pl.program_id(1)

    @pl.when(i == 0)
    def _init():
        inter_ref[...] = jnp.zeros_like(inter_ref)
        denom_ref[...] = jnp.zeros_like(denom_ref)

    def _accum(mask_rows):
        p = _sigmoid(pred_ref[...].astype(jnp.float32))
        t = tgt_ref[...].astype(jnp.float32)
        if mask_rows:
            # Logical (unclamped) block index; garbage / repeated rows in the
            # VMEM buffer are zeroed via select (NOT arithmetic), so NaN
            # garbage never leaks into the sums.
            block = c * steps_per_core + i
            rid = block * tile_rows + jax.lax.broadcasted_iota(
                jnp.int32, (tile_rows, _LANES), 0)
            valid = rid < rows
            p = jnp.where(valid, p, 0.0)
            t = jnp.where(valid, t, 0.0)
        si = jnp.sum(p * t, axis=0, keepdims=True)   # (1, 128)
        sd = jnp.sum(p + t, axis=0, keepdims=True)   # (1, 128)
        inter_ref[0:1, :] += si
        denom_ref[0:1, :] += sd

    if ragged:
        block = c * steps_per_core + i
        needs_mask = (block + 1) * tile_rows > rows
        @pl.when(jnp.logical_not(needs_mask))
        def _full():
            _accum(False)
        @pl.when(needs_mask)
        def _partial():
            _accum(True)
    else:
        _accum(False)


def _partial_sums(pred2d, tgt2d, tile_rows):
    """Returns (sum(sigmoid(p)*t), sum(sigmoid(p)) + sum(t)) over a 2D slab."""
    rows = pred2d.shape[0]

    if rows <= tile_rows:
        iv, dv = pl.pallas_call(
            _dice_small_kernel,
            out_shape=(jax.ShapeDtypeStruct((1, _LANES), jnp.float32),
                       jax.ShapeDtypeStruct((1, _LANES), jnp.float32)),
            in_specs=[pl.BlockSpec(memory_space=pltpu.MemorySpace.VMEM)] * 2,
            out_specs=(pl.BlockSpec(memory_space=pltpu.MemorySpace.VMEM),
                       pl.BlockSpec(memory_space=pltpu.MemorySpace.VMEM)),
        )(pred2d, tgt2d)
        return jnp.sum(iv), jnp.sum(dv)

    assert tile_rows % _SUBLANES == 0
    nblocks = pl.cdiv(rows, tile_rows)
    steps_per_core = pl.cdiv(nblocks, _NCORES)
    ragged = (_NCORES * steps_per_core * tile_rows) != rows

    def in_map(c, i):
        # Clamp so over-partitioned steps never request a fully out-of-bounds
        # block; their contribution is zeroed by the row mask.
        return (jnp.minimum(c * steps_per_core + i, nblocks - 1), 0)

    row_spec = pl.BlockSpec((tile_rows, _LANES), in_map)
    part_spec = pl.BlockSpec((_SUBLANES, _LANES), lambda c, i: (c, 0))
    out_shape = jax.ShapeDtypeStruct((_NCORES * _SUBLANES, _LANES),
                                     jnp.float32)

    kernel = functools.partial(
        _dice_grid_kernel,
        rows=rows,
        tile_rows=tile_rows,
        steps_per_core=steps_per_core,
        ragged=ragged,
    )

    iv, dv = pl.pallas_call(
        kernel,
        out_shape=(out_shape, out_shape),
        grid_spec=pltpu.PrefetchScalarGridSpec(
            num_scalar_prefetch=0,
            grid=(_NCORES, steps_per_core),
            in_specs=[row_spec, row_spec],
            out_specs=(part_spec, part_spec),
        ),
        compiler_params=pltpu.CompilerParams(
            dimension_semantics=("parallel", "arbitrary"),
        ),
    )(pred2d, tgt2d)
    return jnp.sum(iv), jnp.sum(dv)


@functools.partial(jax.jit, static_argnames=("tile_rows",))
def dice_loss(pred, target, *, tile_rows=_TILE_ROWS):
    """1 - dice_coeff(pred, target); matches the PyTorch module semantics."""
    pred_flat = pred.reshape(-1)
    tgt_flat = target.reshape(-1)
    n = pred_flat.shape[0]
    rows = n // _LANES
    rem = n - rows * _LANES

    inter = jnp.zeros((), jnp.float32)
    denom = jnp.zeros((), jnp.float32)

    if rows > 0:
        if rem:
            pred2d = pred_flat[:rows * _LANES].reshape(rows, _LANES)
            tgt2d = tgt_flat[:rows * _LANES].reshape(rows, _LANES)
        else:
            pred2d = pred_flat.reshape(rows, _LANES)   # free bitcast
            tgt2d = tgt_flat.reshape(rows, _LANES)
        iv, dv = _partial_sums(pred2d, tgt2d, tile_rows)
        inter = inter + iv
        denom = denom + dv

    if rem:
        # <=127-element tail folded in plain JAX (no HBM pad copy).
        tp = jax.nn.sigmoid(pred_flat[rows * _LANES:].astype(jnp.float32))
        tt = tgt_flat[rows * _LANES:].astype(jnp.float32)
        inter = inter + jnp.sum(tp * tt)
        denom = denom + jnp.sum(tp) + jnp.sum(tt)

    return 1.0 - (2.0 * inter + _SMOOTH) / (denom + _SMOOTH)


def _dice_loss_ref(pred, target):
    p = jax.nn.sigmoid(pred.astype(jnp.float32)).reshape(-1)
    t = target.astype(jnp.float32).reshape(-1)
    inter = jnp.sum(p * t)
    dice = (2.0 * inter + _SMOOTH) / (jnp.sum(p) + jnp.sum(t) + _SMOOTH)
    return 1.0 - dice


if __name__ == "__main__":
    key = jax.random.PRNGKey(0)
    k1, k2, k3, k4, k5, k6 = jax.random.split(key, 6)

    # Module-consistent small shapes: logits and binary target, NCHW.
    x = jax.random.normal(k1, (2, 4, 16, 16), dtype=jnp.float32)
    tgt = (jax.random.uniform(k2, (2, 4, 16, 16)) > 0.5).astype(jnp.float32)
    loss = dice_loss(x, tgt)
    jax.block_until_ready(loss)
    ref = _dice_loss_ref(x, tgt)
    assert jnp.allclose(loss, ref, atol=1e-5, rtol=1e-5), (loss, ref)

    # Gridded path: ragged row count, dual-core split, misaligned (n % 128) tail.
    xb = jax.random.normal(k3, (2, 4, 300, 301), dtype=jnp.float32)
    tb = (jax.random.uniform(k4, (2, 4, 300, 301)) > 0.5).astype(jnp.float32)
    loss_b = dice_loss(xb, tb)
    jax.block_until_ready(loss_b)
    ref_b = _dice_loss_ref(xb, tb)
    assert jnp.allclose(loss_b, ref_b, atol=1e-4, rtol=1e-4), (loss_b, ref_b)

    # Small path with a 128-misaligned element count (tail folded in wrapper).
    xc = jax.random.normal(k5, (5, 7, 13), dtype=jnp.float32)
    tc = (jax.random.uniform(k6, (5, 7, 13)) > 0.5).astype(jnp.float32)
    loss_c = dice_loss(xc, tc)
    jax.block_until_ready(loss_c)
    ref_c = _dice_loss_ref(xc, tc)
    assert jnp.allclose(loss_c, ref_c, atol=1e-5, rtol=1e-5), (loss_c, ref_c)

    print("KERNEL_OK")
</pallas_src>

<mosaic_0001>
module attributes {stable_mosaic.version = 11 : i64} {
  func.func @_dice_small_kernel(%arg0: memref<16x128xf32, #tpu.memory_space<vmem>>, %arg1: memref<16x128xf32, #tpu.memory_space<vmem>>, %arg2: memref<1x128xf32, #tpu.memory_space<vmem>>, %arg3: memref<1x128xf32, #tpu.memory_space<vmem>>) attributes {dimension_semantics = [], scalar_prefetch = 0 : i64, scratch_operands = 0 : i64, tpu.core_type = #tpu.core_type<tc>} {
    %c0 = arith.constant 0 : index
    %c0_0 = arith.constant 0 : index
    %0 = vector.load %arg0[%c0, %c0_0] : memref<16x128xf32, #tpu.memory_space<vmem>>, vector<16x128xf32>
    %cst = arith.constant 5.000000e-01 : f32
    %1 = vector.broadcast %cst : f32 to vector<16x128xf32>
    %2 = arith.mulf %1, %0 : vector<16x128xf32>
    %3 = math.tanh %2 : vector<16x128xf32>
    %cst_1 = arith.constant 5.000000e-01 : f32
    %4 = vector.broadcast %cst_1 : f32 to vector<16x128xf32>
    %5 = arith.mulf %4, %3 : vector<16x128xf32>
    %cst_2 = arith.constant 5.000000e-01 : f32
    %6 = vector.broadcast %cst_2 : f32 to vector<16x128xf32>
    %7 = arith.addf %5, %6 : vector<16x128xf32>
    %c0_3 = arith.constant 0 : index
    %c0_4 = arith.constant 0 : index
    %8 = vector.load %arg1[%c0_3, %c0_4] : memref<16x128xf32, #tpu.memory_space<vmem>>, vector<16x128xf32>
    %9 = arith.mulf %7, %8 : vector<16x128xf32>
    %cst_5 = arith.constant dense<0.000000e+00> : vector<128xf32>
    %10 = vector.multi_reduction <add>, %9, %cst_5 [0] : vector<16x128xf32> to vector<128xf32>
    %11 = vector.shape_cast %10 : vector<128xf32> to vector<1x128xf32>
    %c0_6 = arith.constant 0 : index
    %c0_7 = arith.constant 0 : index
    %12 = vector.load %arg2[%c0_6, %c0_7] : memref<1x128xf32, #tpu.memory_space<vmem>>, vector<1x128xf32>
    tpu.vector_store %arg2[%c0_6, %c0_7], %11 {strides = array<i32>} : memref<1x128xf32, #tpu.memory_space<vmem>>, vector<1x128xf32>,
    %13 = arith.addf %7, %8 : vector<16x128xf32>
    %cst_8 = arith.constant dense<0.000000e+00> : vector<128xf32>
    %14 = vector.multi_reduction <add>, %13, %cst_8 [0] : vector<16x128xf32> to vector<128xf32>
    %15 = vector.shape_cast %14 : vector<128xf32> to vector<1x128xf32>
    %c0_9 = arith.constant 0 : index
    %c0_10 = arith.constant 0 : index
    %16 = vector.load %arg3[%c0_9, %c0_10] : memref<1x128xf32, #tpu.memory_space<vmem>>, vector<1x128xf32>
    tpu.vector_store %arg3[%c0_9, %c0_10], %15 {strides = array<i32>} : memref<1x128xf32, #tpu.memory_space<vmem>>, vector<1x128xf32>,
    return
  }
}

</mosaic_0001>

<bundles_post_ra>
// kernel: dice_loss.1
= control target key start
LH: loop header
LB: loop body
LE: loop exit
PB: predicated region body
PF: predicated region fallthrough
CT: control target
= control target key end

     0   :  { %s95_s0 = inlined_call_operand.vmem [shape: f32[16,128], index: 0, kind: input, shape index: {}]   ;;  %s96_s1 = inlined_call_operand.vmem [shape: f32[16,128], index: 1, kind: input, shape index: {}]   ;;  %s97_s2 = inlined_call_operand.vmem [shape: f32[1,128], index: 2, kind: output, shape index: {0}]   ;;  %s98_s3 = inlined_call_operand.vmem [shape: f32[1,128], index: 3, kind: output, shape index: {1}]  }
   0x1   :  { %v13_v0 = vld [vmem:[%s95_s0] sm:$0xff]  ;;  %v14_v1 = vld [vmem:[%s95_s0 + $0x8] sm:$0xff] }
   0x2   :  { %v15_v2 = vmul.f32 0.5, %v13_v0  ;;  %v16_v3 = vmul.f32 0.5, %v14_v1  ;;  %v23_v8 = vld [vmem:[%s96_s1] sm:$0xff]  ;;  %v24_v10 = vld [vmem:[%s96_s1 + $0x8] sm:$0xff] }
   0x4   :  { %53 = vtanh.f32 %v15_v2 }
   0x5   :  { %55 = vtanh.f32 %v16_v3 }
  0x11   :  { %v54_v4 = vpop.eup %53 }
  0x12   :  { %v56_v5 = vpop.eup %55  ;;  %v19_v6 = vmul.f32 0.5, %v54_v4 }
  0x13   :  { %v20_v7 = vmul.f32 0.5, %v56_v5 }
  0x14   :  { %v21_v9 = vadd.f32 0.5, %v19_v6 }
  0x15   :  { %v22_v11 = vadd.f32 0.5, %v20_v7 }
  0x16   :  { %v25_v12 = vmul.f32 %v23_v8, %v21_v9  ;;  %v35_v13 = vadd.f32 %v23_v8, %v21_v9 }
  0x17   :  { %v26_v14 = vmul.f32 %v24_v10, %v22_v11  ;;  %v36_v15 = vadd.f32 %v24_v10, %v22_v11 }
  0x19   :  { %v27_v16 = vadd.f32 %v26_v14, %v25_v12  ;;  %v37_v17 = vadd.f32 %v36_v15, %v35_v13 }
  0x1b   :  { %v28_v18 = vrot.slane %v27_v16, 4  ;;  %v38_v19 = vrot.slane %v37_v17, 4 }
  0x1d   :  { %v29_v20 = vadd.f32 %v28_v18, %v27_v16  ;;  %v39_v21 = vadd.f32 %v38_v19, %v37_v17 }
  0x1f   :  { %v30_v22 = vrot.slane %v29_v20, 2  ;;  %v40_v23 = vrot.slane %v39_v21, 2 }
  0x21   :  { %v31_v24 = vadd.f32 %v30_v22, %v29_v20  ;;  %v41_v25 = vadd.f32 %v40_v23, %v39_v21 }
  0x23   :  { %v32_v26 = vrot.slane %v31_v24, 1  ;;  %v42_v27 = vrot.slane %v41_v25, 1 }
  0x25   :  { %v33_v28 = vadd.f32 %v32_v26, %v31_v24  ;;  %v43_v29 = vadd.f32 %v42_v27, %v41_v25 }
  0x27   :  { %34 = vst [vmem:[%s97_s2] sm:$0x1] %v33_v28  ;;  %44 = vst [vmem:[%s98_s3] sm:$0x1] %v43_v29 }

</bundles_post_ra>
